<compile_context>
chip_gen: v6e
topology: v6e:2x2x1
jax: 0.10.0
libtpu: 0.0.40
codegen_flags: <defaults>
</compile_context>

<pallas_src>
import jax
import jax.numpy as jnp
from jax import lax
from jax.experimental import pallas as pl
from jax.experimental.pallas import tpu as pltpu

EPS = 1e-5  # PyTorch BatchNorm1d default


def _round_up(a, b):
    return ((a + b - 1) // b) * b


def _trunk_kernel(x_ref, noise_ref,
                  w1_ref, b1_ref, g1_ref, be1_ref,
                  w2_ref, b2_ref, g2_ref, be2_ref,
                  w3b_ref, b3b_ref,
                  h_ref, bout_ref):
    """Fused: (x+noise) -> lin1 -> bn1 -> relu -> lin2 -> bn2 -> relu,
    plus the tiny last-`hid`-columns slice of linear3 (the `b` head)."""
    x = x_ref[...] + noise_ref[...]                      # normal_(0, .01) + x

    # linear1 + BatchNorm1d (training-mode batch statistics, biased variance)
    h = jnp.dot(x, w1_ref[...], preferred_element_type=jnp.float32) + b1_ref[...]
    mu = jnp.mean(h, axis=0, keepdims=True)
    var = jnp.mean((h - mu) ** 2, axis=0, keepdims=True)
    h = (h - mu) * lax.rsqrt(var + EPS) * g1_ref[...] + be1_ref[...]
    h = jnp.maximum(h, 0.0)

    # linear2 + bn2 + relu
    h2 = jnp.dot(h, w2_ref[...], preferred_element_type=jnp.float32) + b2_ref[...]
    mu2 = jnp.mean(h2, axis=0, keepdims=True)
    var2 = jnp.mean((h2 - mu2) ** 2, axis=0, keepdims=True)
    h2 = (h2 - mu2) * lax.rsqrt(var2 + EPS) * g2_ref[...] + be2_ref[...]
    h2 = jnp.maximum(h2, 0.0)

    h_ref[...] = h2
    # `b` head of linear3: out[:, -hid:] == h2 @ w3[:, -hid:] + b3[-hid:]
    bout_ref[...] = (jnp.dot(h2, w3b_ref[...],
                             preferred_element_type=jnp.float32) + b3b_ref[...])


def _proj_kernel(h_ref, w3_ref, b3_ref, o_ref):
    """linear3 `w` head: [Bp, hid] @ [hid, tn] + bias, tiled over the huge
    output-feature dimension.  w3 tile may be bf16; accumulation is f32."""
    h = h_ref[...].astype(w3_ref.dtype)
    o_ref[...] = (jnp.dot(h, w3_ref[...],
                          preferred_element_type=jnp.float32) + b3_ref[...])


def generator_w5_forward(x, noise, params, *, hid, wcols, tn=8192):
    """tn: lane-dense N tile for the projection (multiple of 128).
    8192 is safe on every generation (f32 tile = 8 MiB, 16 MiB when
    double-buffered, well inside v7x's 64 MiB VMEM)."""
    B = x.shape[0]
    ncols = hid * wcols

    # ---- trunk (tiny: B x 256) + the `b` head of linear3, one invocation ----
    h2, b_out = pl.pallas_call(
        _trunk_kernel,
        out_shape=(jax.ShapeDtypeStruct((B, hid), jnp.float32),
                   jax.ShapeDtypeStruct((B, hid), jnp.float32)),
    )(x, noise,
      params["w1"], params["b1"], params["g1"], params["be1"],
      params["w2"], params["b2"], params["g2"], params["be2"],
      params["w3b"], params["b3b"])

    # ---- big streaming matmul: [Bp, hid] @ [hid, ncols_pad] ----
    tn = min(tn, _round_up(ncols, 128))
    ncols_pad = pl.cdiv(ncols, tn) * tn

    w3w, b3w = params["w3w"], params["b3w"]
    if ncols_pad != ncols:
        # zero-pad the column dim to a tile multiple; sliced off below.
        w3w = jnp.pad(w3w, ((0, 0), (0, ncols_pad - ncols)))
        b3w = jnp.pad(b3w, ((0, 0), (0, ncols_pad - ncols)))

    # Pad batch to a sublane multiple so projection stores are unmasked.
    # (BatchNorm stats were already computed on the true batch above.)
    Bp = max(8, _round_up(B, 8))
    h2p = jnp.pad(h2, ((0, Bp - B), (0, 0)))

    y = pl.pallas_call(
        _proj_kernel,
        out_shape=jax.ShapeDtypeStruct((Bp, ncols_pad), jnp.float32),
        grid_spec=pltpu.PrefetchScalarGridSpec(
            num_scalar_prefetch=0,
            grid=(ncols_pad // tn,),
            in_specs=[
                pl.BlockSpec((Bp, hid), lambda j: (0, 0)),
                pl.BlockSpec((hid, tn), lambda j: (0, j)),
                pl.BlockSpec((1, tn), lambda j: (0, j)),
            ],
            out_specs=pl.BlockSpec((Bp, tn), lambda j: (0, j)),
        ),
        compiler_params=pltpu.CompilerParams(
            dimension_semantics=("parallel",),
            vmem_limit_bytes=64 << 20),
    )(h2p, w3w, b3w)

    # Split / reshape glue (matches the PyTorch .view calls).
    w = y[:B, :ncols].reshape(B, hid, wcols)
    b = b_out
    return w, b


def init_params(key, *, z, hid, wcols, bias=True, w3_dtype=jnp.float32):
    """Deterministic Linear / BatchNorm1d parameter init (PyTorch-style ranges).

    linear3 is stored split into its `w` head (hid*wcols cols) and `b` head
    (hid cols).  Set w3_dtype=jnp.bfloat16 to halve HBM traffic on the
    HBM-bound projection (f32 accumulation is kept either way)."""
    ks = jax.random.split(key, 8)

    def lin_w(k, fan_in, fan_out, dtype=jnp.float32):
        lim = 1.0 / float(fan_in) ** 0.5
        return jax.random.uniform(k, (fan_in, fan_out), jnp.float32,
                                  -lim, lim).astype(dtype)

    def lin_b(k, fan_in, fan_out):
        if not bias:
            return jnp.zeros((1, fan_out), jnp.float32)
        lim = 1.0 / float(fan_in) ** 0.5
        return jax.random.uniform(k, (1, fan_out), jnp.float32, -lim, lim)

    return {
        "w1": lin_w(ks[0], z, hid),   "b1": lin_b(ks[1], z, hid),
        "g1": jnp.ones((1, hid), jnp.float32),
        "be1": jnp.zeros((1, hid), jnp.float32),   # bn bias (zeroed when bias=False)
        "w2": lin_w(ks[2], hid, hid), "b2": lin_b(ks[3], hid, hid),
        "g2": jnp.ones((1, hid), jnp.float32),
        "be2": jnp.zeros((1, hid), jnp.float32),
        # linear3, split column-wise into the huge `w` head and tiny `b` head
        "w3w": lin_w(ks[4], hid, hid * wcols, dtype=w3_dtype),
        "b3w": lin_b(ks[5], hid, hid * wcols),
        "w3b": lin_w(ks[6], hid, hid),
        "b3b": lin_b(ks[7], hid, hid),
    }


if __name__ == "__main__":
    B, Z, HID = 2, 128, 256
    WCOLS = 4 * 4 * 2   # scaled-down stand-in for 16*16*32 (see header note)

    key = jax.random.PRNGKey(0)
    k_x, k_n, k_p = jax.random.split(key, 3)

    x = jax.random.normal(k_x, (B, Z), jnp.float32)
    # TODO(synk): torch's in-place normal_(0, 0.01) is sampled host-side here
    # (deterministic jax.random) instead of with the in-kernel PRNG.
    noise = 0.01 * jax.random.normal(k_n, (B, Z), jnp.float32)
    params = init_params(k_p, z=Z, hid=HID, wcols=WCOLS, bias=True)

    # Default (large-tile) path: tn clamps to the demo's 8192 columns.
    w, b = generator_w5_forward(x, noise, params, hid=HID, wcols=WCOLS)
    jax.block_until_ready((w, b))
    assert w.shape == (B, HID, WCOLS) and b.shape == (B, HID)
    assert w.dtype == jnp.float32 and b.dtype == jnp.float32
    assert bool(jnp.all(jnp.isfinite(w))) and bool(jnp.all(jnp.isfinite(b)))

    # Exercise the multi-step, column-padded tiling path (tn does not divide
    # hid*wcols) and check it matches the single-tile result.
    w2, b2 = generator_w5_forward(x, noise, params, hid=HID, wcols=WCOLS,
                                  tn=1536)
    jax.block_until_ready((w2, b2))
    assert jnp.allclose(w, w2, atol=1e-5, rtol=1e-5)
    assert jnp.allclose(b, b2, atol=1e-5, rtol=1e-5)

    print("KERNEL_OK")
</pallas_src>

<mosaic_0001>
module attributes {stable_mosaic.version = 11 : i64} {
  func.func @_trunk_kernel(%arg0: memref<2x128xf32, #tpu.memory_space<vmem>>, %arg1: memref<2x128xf32, #tpu.memory_space<vmem>>, %arg2: memref<128x256xf32, #tpu.memory_space<vmem>>, %arg3: memref<1x256xf32, #tpu.memory_space<vmem>>, %arg4: memref<1x256xf32, #tpu.memory_space<vmem>>, %arg5: memref<1x256xf32, #tpu.memory_space<vmem>>, %arg6: memref<256x256xf32, #tpu.memory_space<vmem>>, %arg7: memref<1x256xf32, #tpu.memory_space<vmem>>, %arg8: memref<1x256xf32, #tpu.memory_space<vmem>>, %arg9: memref<1x256xf32, #tpu.memory_space<vmem>>, %arg10: memref<256x256xf32, #tpu.memory_space<vmem>>, %arg11: memref<1x256xf32, #tpu.memory_space<vmem>>, %arg12: memref<2x256xf32, #tpu.memory_space<vmem>>, %arg13: memref<2x256xf32, #tpu.memory_space<vmem>>) attributes {dimension_semantics = [], scalar_prefetch = 0 : i64, scratch_operands = 0 : i64, tpu.core_type = #tpu.core_type<tc>} {
    %c0 = arith.constant 0 : index
    %c0_0 = arith.constant 0 : index
    %0 = vector.load %arg0[%c0, %c0_0] : memref<2x128xf32, #tpu.memory_space<vmem>>, vector<2x128xf32>
    %c0_1 = arith.constant 0 : index
    %c0_2 = arith.constant 0 : index
    %1 = vector.load %arg1[%c0_1, %c0_2] : memref<2x128xf32, #tpu.memory_space<vmem>>, vector<2x128xf32>
    %2 = arith.addf %0, %1 : vector<2x128xf32>
    %c0_3 = arith.constant 0 : index
    %c0_4 = arith.constant 0 : index
    %3 = vector.load %arg2[%c0_3, %c0_4] : memref<128x256xf32, #tpu.memory_space<vmem>>, vector<128x256xf32>
    %cst = arith.constant dense<0.000000e+00> : vector<2x256xf32>
    %4 = tpu.matmul %2, %3, %cst {dimension_numbers = #tpu.dot_dimension_numbers<[1], [0], [0], [1], [0, 0, 1, 1], [], []>} : vector<2x128xf32>, vector<128x256xf32>, vector<2x256xf32> -> vector<2x256xf32>
    %c0_5 = arith.constant 0 : index
    %c0_6 = arith.constant 0 : index
    %5 = vector.load %arg3[%c0_5, %c0_6] : memref<1x256xf32, #tpu.memory_space<vmem>>, vector<1x256xf32>
    %6 = vector.broadcast %5 : vector<1x256xf32> to vector<2x256xf32>
    %7 = arith.addf %4, %6 : vector<2x256xf32>
    %cst_7 = arith.constant dense<0.000000e+00> : vector<256xf32>
    %8 = vector.multi_reduction <add>, %7, %cst_7 [0] : vector<2x256xf32> to vector<256xf32>
    %9 = vector.shape_cast %8 : vector<256xf32> to vector<1x256xf32>
    %cst_8 = arith.constant 2.000000e+00 : f32
    %10 = vector.broadcast %cst_8 : f32 to vector<1x256xf32>
    %11 = arith.divf %9, %10 : vector<1x256xf32>
    %12 = vector.broadcast %11 : vector<1x256xf32> to vector<2x256xf32>
    %13 = arith.subf %7, %12 : vector<2x256xf32>
    %14 = arith.mulf %13, %13 : vector<2x256xf32>
    %cst_9 = arith.constant dense<0.000000e+00> : vector<256xf32>
    %15 = vector.multi_reduction <add>, %14, %cst_9 [0] : vector<2x256xf32> to vector<256xf32>
    %16 = vector.shape_cast %15 : vector<256xf32> to vector<1x256xf32>
    %cst_10 = arith.constant 2.000000e+00 : f32
    %17 = vector.broadcast %cst_10 : f32 to vector<1x256xf32>
    %18 = arith.divf %16, %17 : vector<1x256xf32>
    %19 = vector.broadcast %11 : vector<1x256xf32> to vector<2x256xf32>
    %20 = arith.subf %7, %19 : vector<2x256xf32>
    %cst_11 = arith.constant 9.99999974E-6 : f32
    %21 = vector.broadcast %cst_11 : f32 to vector<1x256xf32>
    %22 = arith.addf %18, %21 : vector<1x256xf32>
    %23 = math.rsqrt %22 : vector<1x256xf32>
    %24 = vector.broadcast %23 : vector<1x256xf32> to vector<2x256xf32>
    %25 = arith.mulf %20, %24 : vector<2x256xf32>
    %c0_12 = arith.constant 0 : index
    %c0_13 = arith.constant 0 : index
    %26 = vector.load %arg4[%c0_12, %c0_13] : memref<1x256xf32, #tpu.memory_space<vmem>>, vector<1x256xf32>
    %27 = vector.broadcast %26 : vector<1x256xf32> to vector<2x256xf32>
    %28 = arith.mulf %25, %27 : vector<2x256xf32>
    %c0_14 = arith.constant 0 : index
    %c0_15 = arith.constant 0 : index
    %29 = vector.load %arg5[%c0_14, %c0_15] : memref<1x256xf32, #tpu.memory_space<vmem>>, vector<1x256xf32>
    %30 = vector.broadcast %29 : vector<1x256xf32> to vector<2x256xf32>
    %31 = arith.addf %28, %30 : vector<2x256xf32>
    %cst_16 = arith.constant 0.000000e+00 : f32
    %32 = vector.broadcast %cst_16 : f32 to vector<2x256xf32>
    %33 = arith.maximumf %31, %32 : vector<2x256xf32>
    %c0_17 = arith.constant 0 : index
    %c0_18 = arith.constant 0 : index
    %34 = vector.load %arg6[%c0_17, %c0_18] : memref<256x256xf32, #tpu.memory_space<vmem>>, vector<256x256xf32>
    %cst_19 = arith.constant dense<0.000000e+00> : vector<2x256xf32>
    %35 = tpu.matmul %33, %34, %cst_19 {dimension_numbers = #tpu.dot_dimension_numbers<[1], [0], [0], [1], [0, 0, 1, 1], [], []>} : vector<2x256xf32>, vector<256x256xf32>, vector<2x256xf32> -> vector<2x256xf32>
    %c0_20 = arith.constant 0 : index
    %c0_21 = arith.constant 0 : index
    %36 = vector.load %arg7[%c0_20, %c0_21] : memref<1x256xf32, #tpu.memory_space<vmem>>, vector<1x256xf32>
    %37 = vector.broadcast %36 : vector<1x256xf32> to vector<2x256xf32>
    %38 = arith.addf %35, %37 : vector<2x256xf32>
    %cst_22 = arith.constant dense<0.000000e+00> : vector<256xf32>
    %39 = vector.multi_reduction <add>, %38, %cst_22 [0] : vector<2x256xf32> to vector<256xf32>
    %40 = vector.shape_cast %39 : vector<256xf32> to vector<1x256xf32>
    %cst_23 = arith.constant 2.000000e+00 : f32
    %41 = vector.broadcast %cst_23 : f32 to vector<1x256xf32>
    %42 = arith.divf %40, %41 : vector<1x256xf32>
    %43 = vector.broadcast %42 : vector<1x256xf32> to vector<2x256xf32>
    %44 = arith.subf %38, %43 : vector<2x256xf32>
    %45 = arith.mulf %44, %44 : vector<2x256xf32>
    %cst_24 = arith.constant dense<0.000000e+00> : vector<256xf32>
    %46 = vector.multi_reduction <add>, %45, %cst_24 [0] : vector<2x256xf32> to vector<256xf32>
    %47 = vector.shape_cast %46 : vector<256xf32> to vector<1x256xf32>
    %cst_25 = arith.constant 2.000000e+00 : f32
    %48 = vector.broadcast %cst_25 : f32 to vector<1x256xf32>
    %49 = arith.divf %47, %48 : vector<1x256xf32>
    %50 = vector.broadcast %42 : vector<1x256xf32> to vector<2x256xf32>
    %51 = arith.subf %38, %50 : vector<2x256xf32>
    %cst_26 = arith.constant 9.99999974E-6 : f32
    %52 = vector.broadcast %cst_26 : f32 to vector<1x256xf32>
    %53 = arith.addf %49, %52 : vector<1x256xf32>
    %54 = math.rsqrt %53 : vector<1x256xf32>
    %55 = vector.broadcast %54 : vector<1x256xf32> to vector<2x256xf32>
    %56 = arith.mulf %51, %55 : vector<2x256xf32>
    %c0_27 = arith.constant 0 : index
    %c0_28 = arith.constant 0 : index
    %57 = vector.load %arg8[%c0_27, %c0_28] : memref<1x256xf32, #tpu.memory_space<vmem>>, vector<1x256xf32>
    %58 = vector.broadcast %57 : vector<1x256xf32> to vector<2x256xf32>
    %59 = arith.mulf %56, %58 : vector<2x256xf32>
    %c0_29 = arith.constant 0 : index
    %c0_30 = arith.constant 0 : index
    %60 = vector.load %arg9[%c0_29, %c0_30] : memref<1x256xf32, #tpu.memory_space<vmem>>, vector<1x256xf32>
    %61 = vector.broadcast %60 : vector<1x256xf32> to vector<2x256xf32>
    %62 = arith.addf %59, %61 : vector<2x256xf32>
    %cst_31 = arith.constant 0.000000e+00 : f32
    %63 = vector.broadcast %cst_31 : f32 to vector<2x256xf32>
    %64 = arith.maximumf %62, %63 : vector<2x256xf32>
    %c0_32 = arith.constant 0 : index
    %c0_33 = arith.constant 0 : index
    %65 = vector.load %arg12[%c0_32, %c0_33] : memref<2x256xf32, #tpu.memory_space<vmem>>, vector<2x256xf32>
    tpu.vector_store %arg12[%c0_32, %c0_33], %64 {strides = array<i32>} : memref<2x256xf32, #tpu.memory_space<vmem>>, vector<2x256xf32>,
    %c0_34 = arith.constant 0 : index
    %c0_35 = arith.constant 0 : index
    %66 = vector.load %arg10[%c0_34, %c0_35] : memref<256x256xf32, #tpu.memory_space<vmem>>, vector<256x256xf32>
    %cst_36 = arith.constant dense<0.000000e+00> : vector<2x256xf32>
    %67 = tpu.matmul %64, %66, %cst_36 {dimension_numbers = #tpu.dot_dimension_numbers<[1], [0], [0], [1], [0, 0, 1, 1], [], []>} : vector<2x256xf32>, vector<256x256xf32>, vector<2x256xf32> -> vector<2x256xf32>
    %c0_37 = arith.constant 0 : index
    %c0_38 = arith.constant 0 : index
    %68 = vector.load %arg11[%c0_37, %c0_38] : memref<1x256xf32, #tpu.memory_space<vmem>>, vector<1x256xf32>
    %69 = vector.broadcast %68 : vector<1x256xf32> to vector<2x256xf32>
    %70 = arith.addf %67, %69 : vector<2x256xf32>
    %c0_39 = arith.constant 0 : index
    %c0_40 = arith.constant 0 : index
    %71 = vector.load %arg13[%c0_39, %c0_40] : memref<2x256xf32, #tpu.memory_space<vmem>>, vector<2x256xf32>
    tpu.vector_store %arg13[%c0_39, %c0_40], %70 {strides = array<i32>} : memref<2x256xf32, #tpu.memory_space<vmem>>, vector<2x256xf32>,
    return
  }
}

</mosaic_0001>

<bundles_post_ra>
// kernel: tpu_custom_call.1
= control target key start
LH: loop header
LB: loop body
LE: loop exit
PB: predicated region body
PF: predicated region fallthrough
CT: control target
= control target key end

     0   :  { %19 = vsyncpa [#allocation3], 0  ;;  %s1049_s0 = inlined_call_operand.hbm [shape: f32[2,128], index: 0, kind: input, shape index: {}]   ;;  %s1050_s1 = inlined_call_operand.hbm [shape: f32[2,128], index: 1, kind: input, shape index: {}]   ;;  %s1051_s2 = inlined_call_operand.hbm [shape: f32[128,256], index: 2, kind: input, shape index: {}]   ;;  %s1052_s3 = inlined_call_operand.vmem [shape: f32[1,256], index: 3, kind: input, shape index: {}]   ;;  %s1053_s4 = inlined_call_operand.vmem [shape: f32[1,256], index: 4, kind: input, shape index: {}]   ;;  %s1054_s5 = inlined_call_operand.vmem [shape: f32[1,256], index: 5, kind: input, shape index: {}]   ;;  %s1055_s6 = inlined_call_operand.hbm [shape: f32[256,256], index: 6, kind: input, shape index: {}]   ;;  %s1056_s7 = inlined_call_operand.vmem [shape: f32[1,256], index: 7, kind: input, shape index: {}]   ;;  %s1057_s8 = inlined_call_operand.vmem [shape: f32[1,256], index: 8, kind: input, shape index: {}]   ;;  %s1058_s9 = inlined_call_operand.vmem [shape: f32[1,256], index: 9, kind: input, shape index: {}]   ;;  %s1059_s10 = inlined_call_operand.hbm [shape: f32[256,256], index: 10, kind: input, shape index: {}]   ;;  %s1060_s11 = inlined_call_operand.vmem [shape: f32[1,256], index: 11, kind: input, shape index: {}]   ;;  %s1061_s12 = inlined_call_operand.hbm [shape: f32[2,256], index: 12, kind: output, shape index: {0}]   ;;  %s1062_s13 = inlined_call_operand.hbm [shape: f32[2,256], index: 13, kind: output, shape index: {1}]  }
   0x1   :  { %20 = vsyncpa [#allocation6], 0 }
   0x2   :  { %21 = vsyncpa [#allocation9], 0 }
   0x3   :  { %22 = vsyncpa [#allocation4], 0 }
   0x4   :  { %23 = vsyncpa [#allocation13], 0  ;;  %s892_s25 = smov [#allocation5]  }
   0x5   :  { %s40_s26 = sshll.u32 %s892_s25, 4  ;;  %s41_s26 = int_to_ptr.vmem [resolvable:$true] %s40_s26 }
   0x6   :  { %s750_s27 = scalar_lea.vmem %s41_s26, 32  ;;  %p755_p1 = scmp.lt.s32.totalorder %s41_s26, %s41_s26 }
   0x7   :  { %p751_p0 = scmp.ne.s32.totalorder %s41_s26, %s750_s27  ;;  %p756_p2 = scmp.lt.s32.totalorder %s750_s27, %s750_s27 }
   0x9   :  { %p757_p3 = por %p756_p2, %p755_p1 }
   0xb   :  { %p758_p4 = pnand %p757_p3, %p751_p0 }
   0xd   :  { %761 = shalt.err (!%p758_p4)
}
   0xe   :  { %43 = dma.hbm_to_vmem [thread:$0]  %s1050_s1, 32, %s41_s26, [#allocation6]  }
   0xf   :  { %s893_s30 = smov [#allocation8]   ;;  %s894_s15 = smov [#allocation2]  }
  0x10   :  { %s67_s14 = sshll.u32 %s893_s30, 4  ;;  %s30_s16 = sshll.u32 %s894_s15, 4  ;;  %s68_s14 = int_to_ptr.vmem [resolvable:$true] %s67_s14  ;;  %s31_s16 = int_to_ptr.vmem [resolvable:$true] %s30_s16 }
  0x11   :  { %s770_s17 = scalar_lea.vmem %s68_s14, 8192  ;;  %p775_p6 = scmp.lt.s32.totalorder %s68_s14, %s68_s14 }
  0x12   :  { %p771_p5 = scmp.ne.s32.totalorder %s68_s14, %s770_s17  ;;  %p776_p7 = scmp.lt.s32.totalorder %s770_s17, %s770_s17 }
  0x14   :  { %p777_p8 = por %p776_p7, %p775_p6 }
  0x16   :  { %p778_p9 = pnand %p777_p8, %p771_p5 }
  0x18   :  { %781 = shalt.err (!%p778_p9)
}
  0x19   :  { %s895_s18 = smov 256   ;;  %s896_s19 = smov 16  }
  0x1a   :  { %73 = dma.hbm_to_vmem [thread:$0]  %s1055_s6, 8192, %s68_s14, [#allocation9], %s895_s18, %s895_s18, %s896_s19  }
  0x1b   :  { %s790_s1 = scalar_lea.vmem %s31_s16, 32  ;;  %p795_p11 = scmp.lt.s32.totalorder %s31_s16, %s31_s16 }
  0x1c   :  { %p791_p10 = scmp.ne.s32.totalorder %s31_s16, %s790_s1  ;;  %p796_p12 = scmp.lt.s32.totalorder %s790_s1, %s790_s1 }
  0x1e   :  { %p797_p13 = por %p796_p12, %p795_p11 }
  0x20   :  { %p798_p0 = pnand %p797_p13, %p791_p10 }
  0x22   :  { %801 = shalt.err (!%p798_p0)
}
  0x23   :  { %33 = dma.hbm_to_vmem [thread:$0]  %s1049_s0, 32, %s31_s16, [#allocation3]  }
  0x24   :  { %s897_s24 = smov [#allocation7]   ;;  %s898_s26 = smov [#allocation10]  }
  0x25   :  { %s49_s25 = sshll.u32 %s897_s24, 4  ;;  %s85_s27 = sshll.u32 %s898_s26, 4  ;;  %s50_s25 = int_to_ptr.vmem [resolvable:$true] %s49_s25  ;;  %s86_s27 = int_to_ptr.vmem [resolvable:$true] %s85_s27 }
  0x26   :  { %s810_s28 = scalar_lea.vmem %s50_s25, 4096  ;;  %p815_p2 = scmp.lt.s32.totalorder %s50_s25, %s50_s25 }
  0x27   :  { %p811_p1 = scmp.ne.s32.totalorder %s50_s25, %s810_s28  ;;  %p816_p3 = scmp.lt.s32.totalorder %s810_s28, %s810_s28 }
  0x29   :  { %p817_p4 = por %p816_p3, %p815_p2 }
  0x2b   :  { %p818_p5 = pnand %p817_p4, %p811_p1 }
  0x2d   :  { %821 = shalt.err (!%p818_p5)
}
  0x2e   :  { %55 = dma.hbm_to_vmem [thread:$0]  %s1051_s2, 4096, %s50_s25, [#allocation6], %s895_s18, %s895_s18, %s896_s19  }
  0x2f   :  { %s830_s0 = scalar_lea.vmem %s86_s27, 8192  ;;  %p835_p7 = scmp.lt.s32.totalorder %s86_s27, %s86_s27 }
  0x30   :  { %p831_p6 = scmp.ne.s32.totalorder %s86_s27, %s830_s0  ;;  %p836_p8 = scmp.lt.s32.totalorder %s830_s0, %s830_s0 }
  0x32   :  { %p837_p9 = por %p836_p8, %p835_p7 }
  0x34   :  { %p838_p10 = pnand %p837_p9, %p831_p6 }
  0x36   :  { %841 = shalt.err (!%p838_p10)
}
  0x37   :  { %91 = dma.hbm_to_vmem [thread:$0]  %s1059_s10, 8192, %s86_s27, [#allocation9], %s895_s18, %s895_s18, %s896_s19  }
  0x38   :  { %882 = dma.done.wait [#allocation3], 32  }
  0x39   :  { %883 = vsyncadd [#allocation3], 4294967264 }
  0x3a   :  { %884 = dma.done.wait [#allocation6], 4128  }
  0x3b   :  { %885 = vsyncadd [#allocation6], 4294963168 }
  0x3c   :  { %886 = dma.done.wait [#allocation9], 16384  }
  0x3d   :  { %887 = vsyncadd [#allocation9], 4294950912  ;;  %v899_v0 = vmov 0.0   ;;  %v143_v1 = vld [vmem:[#allocation7 + $0xf8] sm:$0xff]  ;;  %v142_v2 = vld [vmem:[#allocation7 + $0xf0] sm:$0xff]  ;;  %vm227_vm0 = vcmask 1041408  }
  0x3e   :  { %220 = vmatprep.mubr.f32.mxu0 %v899_v0  ;;  %v141_v3 = vld [vmem:[#allocation7 + $0xe8] sm:$0xff]  ;;  %156 = vmatprep.subr.mxu0 %v143_v1  ;;  %v140_v4 = vld [vmem:[#allocation7 + $0xe0] sm:$0xff]  ;;  %v139_v5 = vld [vmem:[#allocation7 + $0xd8] sm:$0xff] }
  0x3f   :  { %157 = vmatpush1.msra.mxu0 %v142_v2  ;;  %v138_v6 = vld [vmem:[#allocation7 + $0xd0] sm:$0xff]  ;;  %v137_v7 = vld [vmem:[#allocation7 + $0xc8] sm:$0xff]  ;;  %v136_v8 = vld [vmem:[#allocation7 + $0xc0] sm:$0xff] }
  0x40   :  { %158 = vmatprep.subr.mxu0 %v141_v3  ;;  %v135_v9 = vld [vmem:[#allocation7 + $0xb8] sm:$0xff]  ;;  %v134_v10 = vld [vmem:[#allocation7 + $0xb0] sm:$0xff]  ;;  %v133_v11 = vld [vmem:[#allocation7 + $0xa8] sm:$0xff] }
  0x41   :  { %159 = vmatpush1.msra.mxu0 %v140_v4  ;;  %v132_v12 = vld [vmem:[#allocation7 + $0xa0] sm:$0xff]  ;;  %v131_v13 = vld [vmem:[#allocation7 + $0x98] sm:$0xff]  ;;  %v130_v14 = vld [vmem:[#allocation7 + $0x90] sm:$0xff] }
  0x42   :  { %160 = vmatprep.subr.mxu0 %v139_v5  ;;  %v129_v15 = vld [vmem:[#allocation7 + $0x88] sm:$0xff]  ;;  %v128_v16 = vld [vmem:[#allocation7 + $0x80] sm:$0xff]  ;;  %v127_v17 = vld [vmem:[#allocation7 + $0x78] sm:$0xff] }
  0x43   :  { %161 = vmatpush1.msra.mxu0 %v138_v6  ;;  %v126_v18 = vld [vmem:[#allocation7 + $0x70] sm:$0xff]  ;;  %v125_v19 = vld [vmem:[#allocation7 + $0x68] sm:$0xff]  ;;  %v124_v20 = vld [vmem:[#allocation7 + $0x60] sm:$0xff] }
  0x44   :  { %162 = vmatprep.subr.mxu0 %v137_v7  ;;  %v123_v21 = vld [vmem:[#allocation7 + $0x58] sm:$0xff]  ;;  %v122_v22 = vld [vmem:[#allocation7 + $0x50] sm:$0xff]  ;;  %v121_v23 = vld [vmem:[#allocation7 + $0x48] sm:$0xff] }
  0x45   :  { %163 = vmatpush1.msra.mxu0 %v136_v8  ;;  %v120_v24 = vld [vmem:[#allocation7 + $0x40] sm:$0xff]  ;;  %v119_v25 = vld [vmem:[#allocation7 + $0x38] sm:$0xff]  ;;  %v118_v26 = vld [vmem:[#allocation7 + $0x30] sm:$0xff] }
  0x46   :  { %164 = vmatprep.subr.mxu0 %v135_v9  ;;  %v117_v27 = vld [vmem:[#allocation7 + $0x28] sm:$0xff]  ;;  %v116_v28 = vld [vmem:[#allocation7 + $0x20] sm:$0xff]  ;;  %v115_v29 = vld [vmem:[#allocation7 + $0x18] sm:$0xff] }
  0x47   :  { %165 = vmatpush1.msra.mxu0 %v134_v10  ;;  %v109_v30 = vld [vmem:[#allocation2] sm:$0x3]  ;;  %v110_v31 = vld [vmem:[#allocation5] sm:$0x3]  ;;  %v114_v32 = vld [vmem:[#allocation7 + $0x10] sm:$0xff] }
  0x48   :  { %166 = vmatprep.subr.mxu0 %v133_v11  ;;  %v113_v33 = vld [vmem:[#allocation7 + $0x8] sm:$0xff]  ;;  %v112_v34 = vld [vmem:[#allocation7] sm:$0xff]  ;;  %v111_v35 = vadd.f32 %v110_v31, %v109_v30  ;;  %v332_v36 = vld [vmem:[#allocation8 + $0xf8] sm:$0xff] }
  0x49   :  { %167 = vmatpush1.msra.mxu0 %v132_v12  ;;  %377 = vmatprep.subr.mxu1 %v332_v36  ;;  %v331_v37 = vld [vmem:[#allocation8 + $0xf0] sm:$0xff]  ;;  %v330_v38 = vld [vmem:[#allocation8 + $0xe8] sm:$0xff]  ;;  %v329_v39 = vld [vmem:[#allocation8 + $0xe0] sm:$0xff]  ;;  %v146_v36 = vlaneseq }
  0x4a   :  { %168 = vmatprep.subr.mxu0 %v131_v13  ;;  %378 = vmatpush1.msra.mxu1 %v331_v37  ;;  %v328_v40 = vld [vmem:[#allocation8 + $0xd8] sm:$0xff]  ;;  %v327_v41 = vld [vmem:[#allocation8 + $0xd0] sm:$0xff]  ;;  %v326_v42 = vld [vmem:[#allocation8 + $0xc8] sm:$0xff] }
  0x4b   :  { %169 = vmatpush1.msra.mxu0 %v130_v14  ;;  %379 = vmatprep.subr.mxu1 %v330_v38  ;;  %v325_v43 = vld [vmem:[#allocation8 + $0xc0] sm:$0xff]  ;;  %v324_v44 = vld [vmem:[#allocation8 + $0xb8] sm:$0xff]  ;;  %v323_v45 = vld [vmem:[#allocation8 + $0xb0] sm:$0xff]  ;;  %v147_v37 = vshrl.u32 %v146_v36, 7 }
  0x4c   :  { %170 = vmatprep.subr.mxu0 %v129_v15  ;;  %380 = vmatpush1.msra.mxu1 %v329_v39  ;;  %v322_v46 = vld [vmem:[#allocation8 + $0xa8] sm:$0xff]  ;;  %v321_v47 = vld [vmem:[#allocation8 + $0xa0] sm:$0xff]  ;;  %v320_v48 = vld [vmem:[#allocation8 + $0x98] sm:$0xff] }
  0x4d   :  { %171 = vmatpush1.msra.mxu0 %v128_v16  ;;  %381 = vmatprep.subr.mxu1 %v328_v40  ;;  %v319_v49 = vld [vmem:[#allocation8 + $0x90] sm:$0xff]  ;;  %v318_v50 = vld [vmem:[#allocation8 + $0x88] sm:$0xff]  ;;  %v317_v51 = vld [vmem:[#allocation8 + $0x80] sm:$0xff]  ;;  %v996_v38 = vsub.s32 0, %v147_v37  ;;  %v1001_v40 = vsub.s32 1, %v147_v37 }
  0x4e   :  { %172 = vmatprep.subr.mxu0 %v127_v17  ;;  %382 = vmatpush1.msra.mxu1 %v327_v41  ;;  %v316_v52 = vld [vmem:[#allocation8 + $0x78] sm:$0xff]  ;;  %v315_v53 = vld [vmem:[#allocation8 + $0x70] sm:$0xff]  ;;  %v314_v54 = vld [vmem:[#allocation8 + $0x68] sm:$0xff] }
  0x4f   :  { %173 = vmatpush1.msra.mxu0 %v126_v18  ;;  %383 = vmatprep.subr.mxu1 %v326_v42  ;;  %v313_v55 = vld [vmem:[#allocation8 + $0x60] sm:$0xff]  ;;  %v312_v56 = vld [vmem:[#allocation8 + $0x58] sm:$0xff]  ;;  %v311_v57 = vld [vmem:[#allocation8 + $0x50] sm:$0xff] }
  0x50   :  { %174 = vmatprep.subr.mxu0 %v125_v19  ;;  %384 = vmatpush1.msra.mxu1 %v325_v43  ;;  %v310_v58 = vld [vmem:[#allocation8 + $0x48] sm:$0xff]  ;;  %v309_v59 = vld [vmem:[#allocation8 + $0x40] sm:$0xff]  ;;  %v308_v60 = vld [vmem:[#allocation8 + $0x38] sm:$0xff] }
  0x51   :  { %175 = vmatpush1.msra.mxu0 %v124_v20  ;;  %385 = vmatprep.subr.mxu1 %v324_v44  ;;  %v307_v61 = vld [vmem:[#allocation8 + $0x30] sm:$0xff]  ;;  %v306_v62 = vld [vmem:[#allocation8 + $0x28] sm:$0xff]  ;;  %v305_v63 = vld [vmem:[#allocation8 + $0x20] sm:$0xff] }
  0x52   :  { %176 = vmatprep.subr.mxu0 %v123_v21  ;;  %386 = vmatpush1.msra.mxu1 %v323_v45  ;;  %v304_v0 = vld [vmem:[#allocation8 + $0x18] sm:$0xff]  ;;  %v303_v1 = vld [vmem:[#allocation8 + $0x10] sm:$0xff]  ;;  %v302_v2 = vld [vmem:[#allocation8 + $0x8] sm:$0xff] }
  0x53   :  { %177 = vmatpush1.msra.mxu0 %v122_v22  ;;  %387 = vmatprep.subr.mxu1 %v322_v46  ;;  %v301_v3 = vld [vmem:[#allocation8] sm:$0xff]  ;;  %v364_v4 = vld [vmem:[#allocation8 + $0x1f8] sm:$0xff]  ;;  %v363_v5 = vld [vmem:[#allocation8 + $0x1f0] sm:$0xff] }
  0x54   :  { %178 = vmatprep.subr.mxu0 %v121_v23  ;;  %388 = vmatpush1.msra.mxu1 %v321_v47  ;;  %v362_v6 = vld [vmem:[#allocation8 + $0x1e8] sm:$0xff]  ;;  %v361_v7 = vld [vmem:[#allocation8 + $0x1e0] sm:$0xff]  ;;  %v360_v8 = vld [vmem:[#allocation8 + $0x1d8] sm:$0xff] }
  0x55   :  { %179 = vmatpush1.msra.mxu0 %v120_v24  ;;  %389 = vmatprep.subr.mxu1 %v320_v48  ;;  %v359_v9 = vld [vmem:[#allocation8 + $0x1d0] sm:$0xff]  ;;  %v358_v10 = vld [vmem:[#allocation8 + $0x1c8] sm:$0xff]  ;;  %v357_v11 = vld [vmem:[#allocation8 + $0x1c0] sm:$0xff] }
  0x56   :  { %180 = vmatprep.subr.mxu0 %v119_v25  ;;  %390 = vmatpush1.msra.mxu1 %v319_v49  ;;  %v356_v12 = vld [vmem:[#allocation8 + $0x1b8] sm:$0xff]  ;;  %v355_v13 = vld [vmem:[#allocation8 + $0x1b0] sm:$0xff]  ;;  %v354_v14 = vld [vmem:[#allocation8 + $0x1a8] sm:$0xff] }
  0x57   :  { %181 = vmatpush1.msra.mxu0 %v118_v26  ;;  %391 = vmatprep.subr.mxu1 %v318_v50  ;;  %v353_v15 = vld [vmem:[#allocation8 + $0x1a0] sm:$0xff]  ;;  %v352_v16 = vld [vmem:[#allocation8 + $0x198] sm:$0xff]  ;;  %v351_v17 = vld [vmem:[#allocation8 + $0x190] sm:$0xff] }
  0x58   :  { %182 = vmatprep.subr.mxu0 %v117_v27  ;;  %392 = vmatpush1.msra.mxu1 %v317_v51  ;;  %v350_v18 = vld [vmem:[#allocation8 + $0x188] sm:$0xff]  ;;  %v349_v19 = vld [vmem:[#allocation8 + $0x180] sm:$0xff]  ;;  %v348_v20 = vld [vmem:[#allocation8 + $0x178] sm:$0xff] }
  0x59   :  { %183 = vmatpush1.msra.mxu0 %v116_v28  ;;  %393 = vmatprep.subr.mxu1 %v316_v52  ;;  %v347_v21 = vld [vmem:[#allocation8 + $0x170] sm:$0xff]  ;;  %v346_v22 = vld [vmem:[#allocation8 + $0x168] sm:$0xff]  ;;  %v345_v23 = vld [vmem:[#allocation8 + $0x160] sm:$0xff] }
  0x5a   :  { %184 = vmatprep.subr.mxu0 %v115_v29  ;;  %394 = vmatpush1.msra.mxu1 %v315_v53  ;;  %v344_v24 = vld [vmem:[#allocation8 + $0x158] sm:$0xff]  ;;  %v343_v25 = vld [vmem:[#allocation8 + $0x150] sm:$0xff]  ;;  %v342_v26 = vld [vmem:[#allocation8 + $0x148] sm:$0xff] }
  0x5b   :  { %185 = vmatpush1.msra.mxu0 %v114_v32  ;;  %395 = vmatprep.subr.mxu1 %v314_v54  ;;  %v341_v27 = vld [vmem:[#allocation8 + $0x140] sm:$0xff]  ;;  %v340_v28 = vld [vmem:[#allocation8 + $0x138] sm:$0xff]  ;;  %v339_v29 = vld [vmem:[#allocation8 + $0x130] sm:$0xff] }
  0x5c   :  { %186 = vmatprep.subr.mxu0 %v113_v33  ;;  %396 = vmatpush1.msra.mxu1 %v313_v55  ;;  %v338_v30 = vld [vmem:[#allocation8 + $0x128] sm:$0xff]  ;;  %v337_v31 = vld [vmem:[#allocation8 + $0x120] sm:$0xff]  ;;  %v336_v32 = vld [vmem:[#allocation8 + $0x118] sm:$0xff] }
  0x5d   :  { %187 = vmatpush1.msra.mxu0 %v112_v34  ;;  %397 = vmatprep.subr.mxu1 %v312_v56  ;;  %v335_v33 = vld [vmem:[#allocation8 + $0x110] sm:$0xff]  ;;  %v334_v34 = vld [vmem:[#allocation8 + $0x108] sm:$0xff]  ;;  %v144_v39 = vld [vmem:[%s1052_s3] sm:$0x3] }
  0x5e   :  { %221 = vmatmul.mubr.f32.vlgmr.msra.gmra.mxu0 %v111_v35  ;;  %398 = vmatpush1.msra.mxu1 %v311_v57  ;;  %v333_v35 = vld [vmem:[#allocation8 + $0x100] sm:$0xff]  ;;  %v149_v41 = vrot.slane %v144_v39, %v996_v38  ;;  %v153_v42 = vrot.slane %v144_v39, %v1001_v40  ;;  %v563_v37 = vld [vmem:[#allocation10 + $0xf8] sm:$0xff]  ;;  %v562_v39 = vld [vmem:[#allocation10 + $0xf0] sm:$0xff] }
  0x5f   :  { %399 = vmatprep.subr.mxu1 %v310_v58  ;;  %608 = vmatprep.subr.mxu0 %v563_v37  ;;  %v565_v37 = vld [vmem:[#allocation10 + $0x108] sm:$0xff] }
  0x60   :  { %400 = vmatpush1.msra.mxu1 %v309_v59  ;;  %609 = vmatpush1.msra.mxu0 %v562_v39  ;;  %v564_v39 = vld [vmem:[#allocation10 + $0x100] sm:$0xff] }
  0x61   :  { %401 = vmatprep.subr.mxu1 %v308_v60 }
  0x62   :  { %402 = vmatpush1.msra.mxu1 %v307_v61 }
  0x63   :  { %403 = vmatprep.subr.mxu1 %v306_v62 }
  0x64   :  { %404 = vmatpush1.msra.mxu1 %v305_v63 }
  0x65   :  { %405 = vmatprep.subr.mxu1 %v304_v0 }
  0x66   :  { %406 = vmatpush1.msra.mxu1 %v303_v1 }
  0x67   :  { %407 = vmatprep.subr.mxu1 %v302_v2 }
  0x68   :  { %408 = vmatpush1.msra.mxu1 %v301_v3 }
  0x69   :  { %409 = vmatprep.subr.mxu1 %v364_v4 }
  0x6a   :  { %410 = vmatpush2.msra.mxu1 %v363_v5 }
  0x6b   :  { %411 = vmatprep.subr.mxu1 %v362_v6 }
  0x6c   :  { %412 = vmatpush2.msra.mxu1 %v361_v7 }
  0x6d   :  { %413 = vmatprep.subr.mxu1 %v360_v8 }
  0x6e   :  { %414 = vmatpush2.msra.mxu1 %v359_v9 }
  0x6f   :  { %415 = vmatprep.subr.mxu1 %v358_v10 }
  0x70   :  { %416 = vmatpush2.msra.mxu1 %v357_v11 }
  0x71   :  { %417 = vmatprep.subr.mxu1 %v356_v12 }
  0x72   :  { %418 = vmatpush2.msra.mxu1 %v355_v13 }
  0x73   :  { %419 = vmatprep.subr.mxu1 %v354_v14 }
  0x74   :  { %420 = vmatpush2.msra.mxu1 %v353_v15 }
  0x75   :  { %421 = vmatprep.subr.mxu1 %v352_v16 }
  0x76   :  { %422 = vmatpush2.msra.mxu1 %v351_v17 }
  0x77   :  { %423 = vmatprep.subr.mxu1 %v350_v18 }
  0x78   :  { %424 = vmatpush2.msra.mxu1 %v349_v19 }
  0x79   :  { %425 = vmatprep.subr.mxu1 %v348_v20 }
  0x7a   :  { %426 = vmatpush2.msra.mxu1 %v347_v21  ;;  %v271_v21 = vld [vmem:[%s1053_s4] sm:$0x3] }
  0x7b   :  { %427 = vmatprep.subr.mxu1 %v346_v22  ;;  %v276_v22 = vrot.slane %v271_v21, %v996_v38 }
  0x7c   :  { %428 = vmatpush2.msra.mxu1 %v345_v23  ;;  %v285_v23 = vld [vmem:[%s1054_s5] sm:$0x3] }
  0x7d   :  { %429 = vmatprep.subr.mxu1 %v344_v24 }
  0x7e   :  { %430 = vmatpush2.msra.mxu1 %v343_v25 }
  0x7f   :  { %431 = vmatprep.subr.mxu1 %v342_v26  ;;  %v280_v26 = vrot.slane %v271_v21, %v1001_v40  ;;  %v581_v21 = vld [vmem:[#allocation10 + $0x188] sm:$0xff] }
  0x80   :  { %432 = vmatpush2.msra.mxu1 %v341_v27 }
  0x81   :  { %433 = vmatprep.subr.mxu1 %v340_v28  ;;  %v290_v28 = vrot.slane %v285_v23, %v996_v38 }
  0x82   :  { %434 = vmatpush2.msra.mxu1 %v339_v29 }
  0x83   :  { %435 = vmatprep.subr.mxu1 %v338_v30  ;;  %v294_v30 = vrot.slane %v285_v23, %v1001_v40  ;;  %v579_v23 = vld [vmem:[#allocation10 + $0x178] sm:$0xff] }
  0x84   :  { %436 = vmatpush2.msra.mxu1 %v337_v31 }
  0x85   :  { %437 = vmatprep.subr.mxu1 %v336_v32 }
  0x86   :  { %438 = vmatpush2.msra.mxu1 %v335_v33 }
  0x87   :  { %439 = vmatprep.subr.mxu1 %v334_v34 }
  0x88   :  { %440 = vmatpush2.msra.mxu1 %v333_v35 }
 0x11e   :  { %v222_v43 = vpop.f32.mrf.mxu0 }
 0x11f   :  { %v223_v44 = vadd.f32 %v222_v43, %v149_v41  ;;  %v561_v41 = vld [vmem:[#allocation10 + $0xe8] sm:$0xff]  ;;  %v559_v43 = vld [vmem:[#allocation10 + $0xd8] sm:$0xff] }
 0x120   :  { %v224_v45 = vpop.f32.mrf.mxu0  ;;  %610 = vmatprep.subr.mxu0 %v561_v41  ;;  %v365_v41 = vld [vmem:[%s1056_s7] sm:$0x3] }
 0x121   :  { %v228_v46 = vsel %vm227_vm0, %v223_v44, 0.0  ;;  %v225_v47 = vadd.f32 %v224_v45, %v153_v42  ;;  %v560_v42 = vld [vmem:[#allocation10 + $0xe0] sm:$0xff]  ;;  %v557_v45 = vld [vmem:[#allocation10 + $0xc8] sm:$0xff] }
 0x122   :  { %v229_v48 = vrot.slane %v228_v46, 4  ;;  %611 = vmatpush1.msra.mxu0 %v560_v42  ;;  %v370_v42 = vrot.slane %v365_v41, %v996_v38 }
 0x123   :  { %v235_v49 = vsel %vm227_vm0, %v225_v47, 0.0  ;;  %612 = vmatprep.subr.mxu0 %v559_v43  ;;  %v374_v43 = vrot.slane %v365_v41, %v1001_v40 }
 0x124   :  { %v230_v50 = vadd.f32 %v229_v48, %v228_v46  ;;  %v236_v51 = vrot.slane %v235_v49, 4  ;;  %v556_v46 = vld [vmem:[#allocation10 + $0xc0] sm:$0xff]  ;;  %v554_v48 = vld [vmem:[#allocation10 + $0xb0] sm:$0xff] }
 0x126   :  { %v231_v52 = vrot.slane %v230_v50, 2  ;;  %v237_v53 = vadd.f32 %v236_v51, %v235_v49  ;;  %v553_v49 = vld [vmem:[#allocation10 + $0xa8] sm:$0xff]  ;;  %v551_v51 = vld [vmem:[#allocation10 + $0x98] sm:$0xff] }
 0x128   :  { %v232_v54 = vadd.f32 %v231_v52, %v230_v50  ;;  %v238_v55 = vrot.slane %v237_v53, 2  ;;  %v552_v50 = vld [vmem:[#allocation10 + $0xa0] sm:$0xff]  ;;  %v550_v52 = vld [vmem:[#allocation10 + $0x90] sm:$0xff] }
 0x12a   :  { %v233_v56 = vrot.slane %v232_v54, 1  ;;  %v239_v57 = vadd.f32 %v238_v55, %v237_v53  ;;  %v549_v53 = vld [vmem:[#allocation10 + $0x88] sm:$0xff]  ;;  %v547_v55 = vld [vmem:[#allocation10 + $0x78] sm:$0xff] }
 0x12c   :  { %v234_v58 = vadd.f32 %v233_v56, %v232_v54  ;;  %v240_v59 = vrot.slane %v239_v57, 1  ;;  %v548_v54 = vld [vmem:[#allocation10 + $0x80] sm:$0xff]  ;;  %v546_v56 = vld [vmem:[#allocation10 + $0x70] sm:$0xff] }
 0x12e   :  { %v243_v60 = vmul.f32 0.5, %v234_v58  ;;  %v241_v61 = vadd.f32 %v240_v59, %v239_v57  ;;  %v545_v57 = vld [vmem:[#allocation10 + $0x68] sm:$0xff]  ;;  %v544_v58 = vld [vmem:[#allocation10 + $0x60] sm:$0xff]  ;;  %v543_v59 = vld [vmem:[#allocation10 + $0x58] sm:$0xff] }
 0x130   :  { %v245_v62 = vsub.f32 %v223_v44, %v243_v60  ;;  %v244_v63 = vmul.f32 0.5, %v241_v61  ;;  %v558_v44 = vld [vmem:[#allocation10 + $0xd0] sm:$0xff]  ;;  %v541_v61 = vld [vmem:[#allocation10 + $0x48] sm:$0xff] }
 0x131   :  { %613 = vmatpush1.msra.mxu0 %v558_v44  ;;  %v542_v60 = vld [vmem:[#allocation10 + $0x50] sm:$0xff] }
 0x132   :  { %v247_v0 = vmul.f32 %v245_v62, %v245_v62  ;;  %v246_v1 = vsub.f32 %v225_v47, %v244_v63  ;;  %614 = vmatprep.subr.mxu0 %v557_v45  ;;  %v555_v47 = vld [vmem:[#allocation10 + $0xb8] sm:$0xff] }
 0x133   :  { %615 = vmatpush1.msra.mxu0 %v556_v46  ;;  %v539_v63 = vld [vmem:[#allocation10 + $0x38] sm:$0xff] }
 0x134   :  { %v249_v2 = vsel %vm227_vm0, %v247_v0, 0.0  ;;  %v248_v3 = vmul.f32 %v246_v1, %v246_v1  ;;  %616 = vmatprep.subr.mxu0 %v555_v47  ;;  %v538_v0 = vld [vmem:[#allocation10 + $0x30] sm:$0xff] }
 0x135   :  { %v250_v4 = vrot.slane %v249_v2, 4  ;;  %617 = vmatpush1.msra.mxu0 %v554_v48 }
 0x136   :  { %v256_v5 = vsel %vm227_vm0, %v248_v3, 0.0  ;;  %618 = vmatprep.subr.mxu0 %v553_v49  ;;  %v535_v3 = vld [vmem:[#allocation10 + $0x18] sm:$0xff] }
 0x137   :  { %v251_v6 = vadd.f32 %v250_v4, %v249_v2  ;;  %v257_v7 = vrot.slane %v256_v5, 4  ;;  %619 = vmatpush1.msra.mxu0 %v552_v50  ;;  %v536_v2 = vld [vmem:[#allocation10 + $0x20] sm:$0xff]  ;;  %v534_v4 = vld [vmem:[#allocation10 + $0x10] sm:$0xff] }
 0x138   :  { %620 = vmatprep.subr.mxu0 %v551_v51 }
 0x139   :  { %v252_v8 = vrot.slane %v251_v6, 2  ;;  %v258_v9 = vadd.f32 %v257_v7, %v256_v5  ;;  %621 = vmatpush1.msra.mxu0 %v550_v52  ;;  %v533_v5 = vld [vmem:[#allocation10 + $0x8] sm:$0xff]  ;;  %v595_v7 = vld [vmem:[#allocation10 + $0x1f8] sm:$0xff] }
 0x13a   :  { %622 = vmatprep.subr.mxu0 %v549_v53 }
 0x13b   :  { %v253_v10 = vadd.f32 %v252_v8, %v251_v6  ;;  %v259_v11 = vrot.slane %v258_v9, 2  ;;  %623 = vmatpush1.msra.mxu0 %v548_v54  ;;  %v532_v6 = vld [vmem:[#allocation10] sm:$0xff]  ;;  %v594_v8 = vld [vmem:[#allocation10 + $0x1f0] sm:$0xff] }
 0x13c   :  { %624 = vmatprep.subr.mxu0 %v547_v55 }
 0x13d   :  { %v254_v12 = vrot.slane %v253_v10, 1  ;;  %v260_v13 = vadd.f32 %v259_v11, %v258_v9  ;;  %625 = vmatpush1.msra.mxu0 %v546_v56  ;;  %v593_v9 = vld [vmem:[#allocation10 + $0x1e8] sm:$0xff]  ;;  %v591_v11 = vld [vmem:[#allocation10 + $0x1d8] sm:$0xff] }
 0x13e   :  { %626 = vmatprep.subr.mxu0 %v545_v57 }
 0x13f   :  { %v255_v14 = vadd.f32 %v254_v12, %v253_v10  ;;  %v261_v15 = vrot.slane %v260_v13, 1  ;;  %627 = vmatpush1.msra.mxu0 %v544_v58  ;;  %v592_v10 = vld [vmem:[#allocation10 + $0x1e0] sm:$0xff]  ;;  %v590_v12 = vld [vmem:[#allocation10 + $0x1d0] sm:$0xff] }
 0x140   :  { %628 = vmatprep.subr.mxu0 %v543_v59 }
 0x141   :  { %v263_v16 = vmul.f32 0.5, %v255_v14  ;;  %v262_v17 = vadd.f32 %v261_v15, %v260_v13  ;;  %629 = vmatpush1.msra.mxu0 %v542_v60  ;;  %v589_v13 = vld [vmem:[#allocation10 + $0x1c8] sm:$0xff]  ;;  %v588_v14 = vld [vmem:[#allocation10 + $0x1c0] sm:$0xff]  ;;  %v587_v15 = vld [vmem:[#allocation10 + $0x1b8] sm:$0xff] }
 0x142   :  { %630 = vmatprep.subr.mxu0 %v541_v61 }
 0x143   :  { %v265_v18 = vadd.f32 1e-05, %v263_v16  ;;  %v264_v19 = vmul.f32 0.5, %v262_v17  ;;  %v586_v16 = vld [vmem:[#allocation10 + $0x1b0] sm:$0xff]  ;;  %v585_v17 = vld [vmem:[#allocation10 + $0x1a8] sm:$0xff] }
 0x145   :  { %734 = vrsqrt.f32 %v265_v18  ;;  %v266_v20 = vadd.f32 1e-05, %v264_v19  ;;  %v584_v18 = vld [vmem:[#allocation10 + $0x1a0] sm:$0xff]  ;;  %v583_v19 = vld [vmem:[#allocation10 + $0x198] sm:$0xff] }
 0x147   :  { %736 = vrsqrt.f32 %v266_v20  ;;  %v582_v20 = vld [vmem:[#allocation10 + $0x190] sm:$0xff] }
 0x152   :  { %v735_v24 = vpop.eup %734 }
 0x153   :  { %v269_v25 = vmul.f32 %v735_v24, %v245_v62  ;;  %v540_v62 = vld [vmem:[#allocation10 + $0x40] sm:$0xff]  ;;  %v578_v24 = vld [vmem:[#allocation10 + $0x170] sm:$0xff] }
 0x154   :  { %v737_v27 = vpop.eup %736  ;;  %631 = vmatpush1.msra.mxu0 %v540_v62 }
 0x155   :  { %v270_v29 = vmul.f32 %v737_v27, %v246_v1  ;;  %v283_v31 = vmul.f32 %v276_v22, %v269_v25  ;;  %632 = vmatprep.subr.mxu0 %v539_v63  ;;  %v537_v1 = vld [vmem:[#allocation10 + $0x28] sm:$0xff]  ;;  %v580_v22 = vld [vmem:[#allocation10 + $0x180] sm:$0xff]  ;;  %v575_v27 = vld [vmem:[#allocation10 + $0x158] sm:$0xff] }
 0x156   :  { %633 = vmatpush1.msra.mxu0 %v538_v0  ;;  %v577_v25 = vld [vmem:[#allocation10 + $0x168] sm:$0xff] }
 0x157   :  { %v284_v32 = vmul.f32 %v280_v26, %v270_v29  ;;  %v297_v33 = vadd.f32 %v290_v28, %v283_v31  ;;  %634 = vmatprep.subr.mxu0 %v537_v1  ;;  %v576_v26 = vld [vmem:[#allocation10 + $0x160] sm:$0xff]  ;;  %v574_v28 = vld [vmem:[#allocation10 + $0x150] sm:$0xff]  ;;  %v573_v29 = vld [vmem:[#allocation10 + $0x148] sm:$0xff] }
 0x158   :  { %635 = vmatpush1.msra.mxu0 %v536_v2  ;;  %v571_v31 = vld [vmem:[#allocation10 + $0x138] sm:$0xff] }
 0x159   :  { %v298_v34 = vadd.f32 %v294_v30, %v284_v32  ;;  %v299_v36 = vmax.f32 %v297_v33, 0.0  ;;  %636 = vmatprep.subr.mxu0 %v535_v3  ;;  %v572_v30 = vld [vmem:[#allocation10 + $0x140] sm:$0xff]  ;;  %v570_v32 = vld [vmem:[#allocation10 + $0x130] sm:$0xff]  ;;  %v569_v33 = vld [vmem:[#allocation10 + $0x128] sm:$0xff] }
 0x15a   :  { %637 = vmatpush1.msra.mxu0 %v534_v4 }
 0x15b   :  { %v300_v35 = vmax.f32 %v298_v34, 0.0  ;;  %638 = vmatprep.subr.mxu0 %v533_v5  ;;  %v568_v34 = vld [vmem:[#allocation10 + $0x120] sm:$0xff] }
 0x15c   :  { %639 = vmatpush1.msra.mxu0 %v532_v6 }
 0x15d   :  { %441 = vmatprep.mubr.f32.mxu1 %v300_v35  ;;  %640 = vmatprep.subr.mxu0 %v595_v7  ;;  %v567_v35 = vld [vmem:[#allocation10 + $0x118] sm:$0xff] }
 0x15e   :  { %442 = vmatmul.mubr.f32.vlgmr.msra.gmra.mxu1 %v299_v36  ;;  %641 = vmatpush2.msra.mxu0 %v594_v8  ;;  %v566_v36 = vld [vmem:[#allocation10 + $0x110] sm:$0xff] }
 0x15f   :  { %642 = vmatprep.subr.mxu0 %v593_v9 }
 0x160   :  { %643 = vmatpush2.msra.mxu0 %v592_v10 }
 0x161   :  { %644 = vmatprep.subr.mxu0 %v591_v11 }
 0x162   :  { %645 = vmatpush2.msra.mxu0 %v590_v12 }
 0x163   :  { %646 = vmatprep.subr.mxu0 %v589_v13 }
 0x164   :  { %647 = vmatpush2.msra.mxu0 %v588_v14 }
 0x165   :  { %648 = vmatprep.subr.mxu0 %v587_v15 }
 0x166   :  { %649 = vmatpush2.msra.mxu0 %v586_v16 }
 0x167   :  { %650 = vmatprep.subr.mxu0 %v585_v17 }
 0x168   :  { %651 = vmatpush2.msra.mxu0 %v584_v18 }
 0x169   :  { %652 = vmatprep.subr.mxu0 %v583_v19 }
 0x16a   :  { %653 = vmatpush2.msra.mxu0 %v582_v20 }
 0x16b   :  { %654 = vmatprep.subr.mxu0 %v581_v21 }
 0x16c   :  { %655 = vmatpush2.msra.mxu0 %v580_v22  ;;  %v490_v22 = vld [vmem:[%s1057_s8] sm:$0x3]  ;;  %s900_s8 = smov [#allocation11]  }
 0x16d   :  { %656 = vmatprep.subr.mxu0 %v579_v23  ;;  %v504_v23 = vld [vmem:[%s1058_s9] sm:$0x3]  ;;  %s697_s9 = sshll.u32 %s900_s8, 4  ;;  %s698_s9 = int_to_ptr.vmem [resolvable:$true] %s697_s9 }
 0x16e   :  { %657 = vmatpush2.msra.mxu0 %v578_v24  ;;  %v495_v24 = vrot.slane %v490_v22, %v996_v38  ;;  %s842_s21 = scalar_lea.vmem %s698_s9, 64  ;;  %p847_p12 = scmp.lt.s32.totalorder %s698_s9, %s698_s9 }
 0x16f   :  { %658 = vmatprep.subr.mxu0 %v577_v25  ;;  %p843_p11 = scmp.ne.s32.totalorder %s698_s9, %s842_s21  ;;  %p848_p13 = scmp.lt.s32.totalorder %s842_s21, %s842_s21 }
 0x170   :  { %659 = vmatpush2.msra.mxu0 %v576_v26 }
 0x171   :  { %660 = vmatprep.subr.mxu0 %v575_v27  ;;  %v499_v27 = vrot.slane %v490_v22, %v1001_v40  ;;  %p849_p0 = por %p848_p13, %p847_p12 }
 0x172   :  { %661 = vmatpush2.msra.mxu0 %v574_v28  ;;  %v509_v28 = vrot.slane %v504_v23, %v996_v38 }
 0x173   :  { %662 = vmatprep.subr.mxu0 %v573_v29  ;;  %p850_p1 = pnand %p849_p0, %p843_p11 }
 0x174   :  { %663 = vmatpush2.msra.mxu0 %v572_v30 }
 0x175   :  { %664 = vmatprep.subr.mxu0 %v571_v31 }
 0x176   :  { %665 = vmatpush2.msra.mxu0 %v570_v32  ;;  %v513_v32 = vrot.slane %v504_v23, %v1001_v40 }
 0x177   :  { %666 = vmatprep.subr.mxu0 %v569_v33 }
 0x178   :  { %667 = vmatpush2.msra.mxu0 %v568_v34 }
 0x179   :  { %668 = vmatprep.subr.mxu0 %v567_v35 }
 0x17a   :  { %669 = vmatpush2.msra.mxu0 %v566_v36 }
 0x17b   :  { %670 = vmatprep.subr.mxu0 %v565_v37 }
 0x17c   :  { %671 = vmatpush2.msra.mxu0 %v564_v39 }
 0x21e   :  { %v443_v44 = vpop.f32.mrf.mxu1 }
 0x21f   :  { %v444_v45 = vadd.f32 %v443_v44, %v370_v42 }
 0x220   :  { %v445_v46 = vpop.f32.mrf.mxu1 }
 0x221   :  { %v448_v47 = vsel %vm227_vm0, %v444_v45, 0.0  ;;  %v446_v48 = vadd.f32 %v445_v46, %v374_v43 }
 0x222   :  { %v449_v49 = vrot.slane %v448_v47, 4 }
 0x223   :  { %v455_v50 = vsel %vm227_vm0, %v446_v48, 0.0 }
 0x224   :  { %v450_v51 = vadd.f32 %v449_v49, %v448_v47  ;;  %v456_v52 = vrot.slane %v455_v50, 4 }
 0x226   :  { %v451_v53 = vrot.slane %v450_v51, 2  ;;  %v457_v54 = vadd.f32 %v456_v52, %v455_v50 }
 0x228   :  { %v452_v55 = vadd.f32 %v451_v53, %v450_v51  ;;  %v458_v56 = vrot.slane %v457_v54, 2 }
 0x22a   :  { %v453_v57 = vrot.slane %v452_v55, 1  ;;  %v459_v58 = vadd.f32 %v458_v56, %v457_v54 }
 0x22c   :  { %v454_v59 = vadd.f32 %v453_v57, %v452_v55  ;;  %v460_v60 = vrot.slane %v459_v58, 1 }
 0x22e   :  { %v462_v61 = vmul.f32 0.5, %v454_v59  ;;  %v461_v62 = vadd.f32 %v460_v60, %v459_v58 }
 0x230   :  { %v464_v63 = vsub.f32 %v444_v45, %v462_v61  ;;  %v463_v0 = vmul.f32 0.5, %v461_v62 }
 0x232   :  { %v466_v1 = vmul.f32 %v464_v63, %v464_v63  ;;  %v465_v2 = vsub.f32 %v446_v48, %v463_v0 }
 0x234   :  { %v468_v3 = vsel %vm227_vm0, %v466_v1, 0.0  ;;  %v467_v4 = vmul.f32 %v465_v2, %v465_v2 }
 0x235   :  { %v469_v5 = vrot.slane %v468_v3, 4 }
 0x236   :  { %v475_v6 = vsel %vm227_vm0, %v467_v4, 0.0 }
 0x237   :  { %v470_v7 = vadd.f32 %v469_v5, %v468_v3  ;;  %v476_v8 = vrot.slane %v475_v6, 4 }
 0x239   :  { %v471_v9 = vrot.slane %v470_v7, 2  ;;  %v477_v10 = vadd.f32 %v476_v8, %v475_v6 }
 0x23b   :  { %v472_v11 = vadd.f32 %v471_v9, %v470_v7  ;;  %v478_v12 = vrot.slane %v477_v10, 2 }
 0x23d   :  { %v473_v13 = vrot.slane %v472_v11, 1  ;;  %v479_v14 = vadd.f32 %v478_v12, %v477_v10 }
 0x23f   :  { %v474_v15 = vadd.f32 %v473_v13, %v472_v11  ;;  %v480_v16 = vrot.slane %v479_v14, 1 }
 0x241   :  { %v482_v17 = vmul.f32 0.5, %v474_v15  ;;  %v481_v18 = vadd.f32 %v480_v16, %v479_v14 }
 0x243   :  { %v484_v19 = vadd.f32 1e-05, %v482_v17  ;;  %v483_v20 = vmul.f32 0.5, %v481_v18 }
 0x245   :  { %738 = vrsqrt.f32 %v484_v19  ;;  %v485_v21 = vadd.f32 1e-05, %v483_v20 }
 0x247   :  { %740 = vrsqrt.f32 %v485_v21 }
 0x252   :  { %v739_v25 = vpop.eup %738 }
 0x253   :  { %v488_v26 = vmul.f32 %v739_v25, %v464_v63 }
 0x254   :  { %v741_v29 = vpop.eup %740 }
 0x255   :  { %v502_v30 = vmul.f32 %v495_v24, %v488_v26  ;;  %v489_v31 = vmul.f32 %v741_v29, %v465_v2 }
 0x257   :  { %v503_v33 = vmul.f32 %v499_v27, %v489_v31  ;;  %v516_v34 = vadd.f32 %v509_v28, %v502_v30 }
 0x259   :  { %v517_v35 = vadd.f32 %v513_v32, %v503_v33  ;;  %v518_v37 = vmax.f32 %v516_v34, 0.0 }
 0x25b   :  { %v519_v36 = vmax.f32 %v517_v35, 0.0 }
 0x25d   :  { %672 = vmatprep.mubr.f32.mxu0 %v519_v36  ;;  %v522_v39 = vcombine.low %v518_v37, %v519_v36 }
 0x25e   :  { %673 = vmatmul.mubr.f32.vlgmr.msra.gmra.mxu0 %v518_v37 }
 0x25f   :  { %722 = vst.sshfl [vmem:[#allocation11] sm:$0x33 pattern:$0x76325410] %v522_v39 }
 0x260   :  { %853 = shalt.err (!%p850_p1)
}
 0x261   :  { %700 = dma.vmem_to_hbm [thread:$0]  %s698_s9, 64, %s1061_s12, [#allocation4]   ;;  %v596_v41 = vld [vmem:[%s1060_s11] sm:$0x3] }
 0x262   :  { %v601_v42 = vrot.slane %v596_v41, %v996_v38  ;;  %v605_v43 = vrot.slane %v596_v41, %v1001_v40  ;;  %s901_s25 = smov [#allocation12]  }
 0x263   :  { %s707_s26 = sshll.u32 %s901_s25, 4  ;;  %s708_s26 = int_to_ptr.vmem [resolvable:$true] %s707_s26 }
 0x264   :  { %s862_s27 = scalar_lea.vmem %s708_s26, 64  ;;  %p867_p3 = scmp.lt.s32.totalorder %s708_s26, %s708_s26 }
 0x265   :  { %p863_p2 = scmp.ne.s32.totalorder %s708_s26, %s862_s27  ;;  %p868_p4 = scmp.lt.s32.totalorder %s862_s27, %s862_s27 }
 0x267   :  { %p869_p5 = por %p868_p4, %p867_p3 }
 0x269   :  { %p870_p6 = pnand %p869_p5, %p863_p2 }
 0x31e   :  { %v674_v44 = vpop.f32.mrf.mxu0 }
 0x31f   :  { %v675_v46 = vadd.f32 %v674_v44, %v601_v42 }
 0x320   :  { %v676_v45 = vpop.f32.mrf.mxu0 }
 0x321   :  { %v677_v47 = vadd.f32 %v676_v45, %v605_v43 }
 0x323   :  { %v681_v48 = vcombine.low %v675_v46, %v677_v47 }
 0x325   :  { %723 = vst.sshfl [vmem:[#allocation12] sm:$0x33 pattern:$0x76325410] %v681_v48 }
 0x326   :  { %873 = shalt.err (!%p870_p6)
}
 0x327   :  { %710 = dma.vmem_to_hbm [thread:$0]  %s708_s26, 64, %s1062_s13, [#allocation13]  }
 0x328   :  { %888 = dma.done.wait [#allocation4], 64  }
 0x329   :  { %889 = vsyncadd [#allocation4], 4294967232 }
 0x32a   :  { %890 = dma.done.wait [#allocation13], 64  }
 0x32b   :  { %891 = vsyncadd [#allocation13], 4294967232 }
 0x32c   :  { %717 = vsyncpa [#allocation3], 1 }
 0x32d   :  { %718 = vsyncpa [#allocation6], 1 }
 0x32e   :  { %719 = vsyncpa [#allocation9], 1 }
 0x32f   :  { %720 = vsyncpa [#allocation4], 1 }
 0x330   :  { %721 = vsyncpa [#allocation13], 1 }

</bundles_post_ra>
